<compile_context>
chip_gen: v7x
topology: tpu7x:2x2x1
jax: 0.10.0
libtpu: 0.0.40
codegen_flags: <defaults>
</compile_context>

<pallas_src>
import jax
import jax.numpy as jnp
from jax import lax
from jax.experimental import pallas as pl
from jax.experimental.pallas import tpu as pltpu


# ----------------------------------------------------------------------------
# Plain-JAX glue: bidirectional, multi-layer LSTM matching PyTorch
# pack_padded_sequence semantics (backward dir starts at the true seq end,
# outputs past the sequence length are zero).
# TODO(synk): LSTM inter-layer dropout (0.3) is training-only; omitted here.
# ----------------------------------------------------------------------------
def _lstm_dir(x, w_ih, w_hh, b_ih, b_hh):
    """Unidirectional LSTM over padded (B, T, D).  PyTorch gate order i,f,g,o."""
    B, T, _ = x.shape
    H = w_hh.shape[1]

    # Hoist the input projection out of the sequential scan: one MXU-friendly
    # (B*T, 4H) matmul instead of T tiny ones inside the recurrence.
    x_proj = jnp.einsum('btd,gd->btg', x, w_ih) + (b_ih + b_hh)   # (B, T, 4H)

    def step(carry, xp_t):
        h, c = carry
        gates = xp_t + h @ w_hh.T
        i, f, g, o = jnp.split(gates, 4, axis=-1)
        i = jax.nn.sigmoid(i)
        f = jax.nn.sigmoid(f)
        g = jnp.tanh(g)
        o = jax.nn.sigmoid(o)
        c = f * c + i * g
        h = o * jnp.tanh(c)
        return (h, c), h

    init = (jnp.zeros((B, H), x.dtype), jnp.zeros((B, H), x.dtype))
    _, hs = lax.scan(step, init, jnp.swapaxes(x_proj, 0, 1))
    return jnp.swapaxes(hs, 0, 1)  # (B, T, H)


def _bilstm_layer(x, lens, fwd, bwd):
    B, T, _ = x.shape
    mask = (jnp.arange(T)[None, :] < lens[:, None]).astype(x.dtype)[..., None]
    h_f = _lstm_dir(x, *fwd) * mask
    # reverse-within-length (== packed-sequence backward direction)
    idx = jnp.clip(lens[:, None] - 1 - jnp.arange(T)[None, :], 0, T - 1)
    idx3 = jnp.broadcast_to(idx[..., None], x.shape)
    x_rev = jnp.take_along_axis(x, idx3, axis=1)
    h_r = _lstm_dir(x_rev, *bwd)
    idx3h = jnp.broadcast_to(idx[..., None], h_r.shape)
    h_b = jnp.take_along_axis(h_r, idx3h, axis=1) * mask
    return jnp.concatenate([h_f, h_b], axis=-1)


def run_bilstm(params, x, lens):
    h = x
    for layer in params:
        h = _bilstm_layer(h, lens, layer["fwd"], layer["bwd"])
    return h


def col_name_encode(col_inp_var, col_name_len, col_len_list, lstm_params):
    """e_col[b, i] = last LSTM state of the i-th column name of example b."""
    name_hidden = run_bilstm(lstm_params, col_inp_var, col_name_len)
    total = col_inp_var.shape[0]
    name_out = name_hidden[jnp.arange(total), col_name_len - 1]  # (total, N_h)
    B = len(col_len_list)
    max_col = max(col_len_list)
    n_h = name_out.shape[-1]
    e_col = jnp.zeros((B, max_col, n_h), jnp.float32)
    st = 0
    for i, cl in enumerate(col_len_list):
        e_col = e_col.at[i, :cl].set(name_out[st:st + cl])
        st += cl
    return e_col


# ----------------------------------------------------------------------------
# Pallas kernel: whole-batch column attention + selection score
# ----------------------------------------------------------------------------
def _sel_score_kernel(x_len_ref, col_num_ref,        # (Bb,1,1), (Bb,1) int32
                      e_col_ref, h_enc_ref,          # bf16 activations
                      w_att_ref, b_att_ref,          # attention projection
                      w_kc_ref, b_kc_ref,            # fused [W_k; W_col], b_k+b_col
                      w_out_ref, b_out_ref,          # output row (VMEM) + scalar (SMEM)
                      out_ref):
    ec = e_col_ref[...]            # (Bb, C, N) bf16
    h = h_enc_ref[...]             # (Bb, T, N) bf16
    bb, c_p, n_p = ec.shape
    t_p = h.shape[1]

    # --- attention projection: proj = h @ W_att^T + b_att (batch folded to rows)
    proj = jnp.dot(h.reshape(bb * t_p, n_p), w_att_ref[...],
                   preferred_element_type=jnp.float32) + b_att_ref[...]
    proj = proj.reshape(bb, t_p, n_p).astype(jnp.bfloat16)

    # --- att_val[b,c,t] = <e_col[b,c,:], proj[b,t,:]>  (batched MXU)
    att_val = jnp.einsum('bcn,btn->bct', ec, proj,
                         preferred_element_type=jnp.float32)

    # --- mask padded question tokens with -100, softmax over T
    t_ids = lax.broadcasted_iota(jnp.int32, (bb, c_p, t_p), 2)
    att_val = jnp.where(t_ids >= x_len_ref[...], jnp.float32(-100.0), att_val)
    m = jnp.max(att_val, axis=-1, keepdims=True)
    e = jnp.exp(att_val - m)
    att = e * pl.reciprocal(jnp.sum(e, axis=-1, keepdims=True), approx=False)

    # --- K_sel[b,c,:] = sum_t att[b,c,t] * h[b,t,:]
    k_sel = jnp.einsum('bct,btn->bcn', att.astype(jnp.bfloat16), h,
                       preferred_element_type=jnp.float32)

    # --- fused output MLP: tanh([K_sel, e_col] @ [W_k; W_col] + (b_k + b_col))
    cat = jnp.concatenate([k_sel.astype(jnp.bfloat16), ec], axis=-1)  # (Bb,C,2N)
    hid = jnp.tanh(
        jnp.dot(cat.reshape(bb * c_p, 2 * n_p), w_kc_ref[...],
                preferred_element_type=jnp.float32) + b_kc_ref[...])
    hid = hid.reshape(bb, c_p, n_p)

    # --- score = hid . w_out + b_out  (VPU mul + lane reduce; no N=1 matmul)
    score = jnp.sum(hid * w_out_ref[...], axis=-1) + b_out_ref[0, 0]

    # --- mask padded columns with -100; lane-dense (Bb, C) store
    c_ids = lax.broadcasted_iota(jnp.int32, (bb, c_p), 1)
    out_ref[...] = jnp.where(c_ids >= col_num_ref[...],
                             jnp.float32(-100.0), score)


def _round_up(x, m):
    return (x + m - 1) // m * m


def sel_score_pallas(e_col, h_enc, x_len, col_num,
                     att_w, att_b, k_w, k_b, col_w, col_b, out_w, out_b,
                     *, num_blocks=1):
    """Column-attention selection scores.  num_blocks=1 collapses the grid
    (optimal for v5e/v6e, 1 TC); use num_blocks=2 on v7x to feed both TCs."""
    B, C, n_h = e_col.shape
    T = h_enc.shape[1]
    assert B % num_blocks == 0
    b_blk = B // num_blocks

    # Pad to TPU-friendly tiles: T/C -> x16 sublanes (bf16 native tile, makes
    # the in-kernel leading-dim reshapes tile-aligned), features -> x128 lanes
    # (unmasked loads, clean MXU K/N).  Zero padding is exact: padded features
    # contribute 0 everywhere and padded rows are masked to -100.
    c_p = _round_up(C, 16)
    t_p = _round_up(T, 16)
    n_p = _round_up(n_h, 128)

    def pad2(x, r, c):
        return jnp.pad(x, ((0, r - x.shape[0]), (0, c - x.shape[1])))

    def pad3(x, d1, d2):
        return jnp.pad(x, ((0, 0), (0, d1 - x.shape[1]), (0, d2 - x.shape[2])))

    e_col_p = pad3(e_col, c_p, n_p).astype(jnp.bfloat16)
    h_enc_p = pad3(h_enc, t_p, n_p).astype(jnp.bfloat16)

    w_att_p = pad2(att_w.T, n_p, n_p).astype(jnp.bfloat16)
    b_att_p = pad2(att_b.reshape(1, n_h), 1, n_p)                    # f32

    # Fuse sel_out_K / sel_out_col: one (2N, N) weight, one pre-summed bias.
    w_kc_p = jnp.concatenate(
        [pad2(k_w.T, n_p, n_p), pad2(col_w.T, n_p, n_p)], axis=0
    ).astype(jnp.bfloat16)                                           # (2N_p, N_p)
    b_kc_p = pad2((k_b + col_b).reshape(1, n_h), 1, n_p)             # f32

    w_out_p = pad2(out_w.reshape(1, n_h), 1, n_p)                    # f32 (VPU)
    b_out_p = out_b.reshape(1, 1).astype(jnp.float32)                # SMEM scalar

    x_len_p = x_len.astype(jnp.int32).reshape(B, 1, 1)
    col_num_p = col_num.astype(jnp.int32).reshape(B, 1)

    # TODO(synk): at production SQLNet shapes (T~200, C~64, large B) re-derive
    # the per-generation VMEM budget (v7x: 64 MiB) and tile over B / set
    # pltpu.CompilerParams(vmem_limit_bytes=...).
    out = pl.pallas_call(
        _sel_score_kernel,
        out_shape=jax.ShapeDtypeStruct((B, c_p), jnp.float32),
        grid=(num_blocks,),
        in_specs=[
            pl.BlockSpec((b_blk, 1, 1), lambda i: (i, 0, 0)),        # x_len
            pl.BlockSpec((b_blk, 1), lambda i: (i, 0)),              # col_num
            pl.BlockSpec((b_blk, c_p, n_p), lambda i: (i, 0, 0)),    # e_col
            pl.BlockSpec((b_blk, t_p, n_p), lambda i: (i, 0, 0)),    # h_enc
            pl.BlockSpec((n_p, n_p), lambda i: (0, 0)),              # W_att^T
            pl.BlockSpec((1, n_p), lambda i: (0, 0)),                # b_att
            pl.BlockSpec((2 * n_p, n_p), lambda i: (0, 0)),          # [W_k;W_col]^T
            pl.BlockSpec((1, n_p), lambda i: (0, 0)),                # b_k + b_col
            pl.BlockSpec((1, n_p), lambda i: (0, 0)),                # w_out row
            pl.BlockSpec(memory_space=pltpu.MemorySpace.SMEM),       # b_out scalar
        ],
        out_specs=pl.BlockSpec((b_blk, c_p), lambda i: (i, 0)),
        compiler_params=pltpu.CompilerParams(
            dimension_semantics=("parallel",)),
    )(x_len_p, col_num_p, e_col_p, h_enc_p,
      w_att_p, b_att_p, w_kc_p, b_kc_p, w_out_p, b_out_p)
    return out[:, :C]


# ----------------------------------------------------------------------------
# Parameter construction (deterministic, shapes from the module __init__)
# ----------------------------------------------------------------------------
def init_linear(key, in_dim, out_dim):
    k1, k2 = jax.random.split(key)
    s = 1.0 / float(in_dim) ** 0.5
    w = jax.random.uniform(k1, (out_dim, in_dim), jnp.float32, -s, s)
    b = jax.random.uniform(k2, (out_dim,), jnp.float32, -s, s)
    return w, b


def init_bilstm(key, input_size, n_h, n_depth):
    H = n_h // 2
    params = []
    for layer in range(n_depth):
        in_dim = input_size if layer == 0 else n_h
        layer_p = {}
        for dname in ("fwd", "bwd"):
            key, k1, k2, k3, k4 = jax.random.split(key, 5)
            s = 1.0 / float(H) ** 0.5
            w_ih = jax.random.uniform(k1, (4 * H, in_dim), jnp.float32, -s, s)
            w_hh = jax.random.uniform(k2, (4 * H, H), jnp.float32, -s, s)
            b_ih = jax.random.uniform(k3, (4 * H,), jnp.float32, -s, s)
            b_hh = jax.random.uniform(k4, (4 * H,), jnp.float32, -s, s)
            layer_p[dname] = (w_ih, w_hh, b_ih, b_hh)
        params.append(layer_p)
    return params, key


class SelPredictorPallas:
    def __init__(self, N_word, N_h, N_depth, max_tok_num, use_ca, key):
        assert use_ca, "forward as written only type-checks with use_ca=True"
        self.N_h = N_h
        self.sel_lstm, key = init_bilstm(key, N_word, N_h, N_depth)
        self.sel_col_name_enc, key = init_bilstm(key, N_word, N_h, N_depth)
        key, k1, k2, k3, k4 = jax.random.split(key, 5)
        self.att_w, self.att_b = init_linear(k1, N_h, N_h)       # sel_att
        self.k_w, self.k_b = init_linear(k2, N_h, N_h)           # sel_out_K
        self.col_w, self.col_b = init_linear(k3, N_h, N_h)       # sel_out_col
        self.out_w, self.out_b = init_linear(k4, N_h, 1)         # sel_out[1]

    def encode(self, x_emb_var, x_len, col_inp_var, col_name_len, col_len_list):
        e_col = col_name_encode(col_inp_var, col_name_len, col_len_list,
                                self.sel_col_name_enc)
        h_enc = run_bilstm(self.sel_lstm, x_emb_var, x_len)
        return e_col, h_enc

    def __call__(self, x_emb_var, x_len, col_inp_var, col_name_len,
                 col_len_list, col_num, num_blocks=1):
        e_col, h_enc = self.encode(x_emb_var, x_len, col_inp_var,
                                   col_name_len, col_len_list)
        return sel_score_pallas(e_col, h_enc, x_len, col_num,
                                self.att_w, self.att_b, self.k_w, self.k_b,
                                self.col_w, self.col_b, self.out_w, self.out_b,
                                num_blocks=num_blocks)


# Pure-JAX reference of the attention / score path (for validation only).
def reference_scores(e_col, h_enc, x_len, col_num,
                     att_w, att_b, k_w, k_b, col_w, col_b, out_w, out_b):
    B, C, _ = e_col.shape
    T = h_enc.shape[1]
    proj = h_enc @ att_w.T + att_b
    att_val = jnp.einsum('bcn,btn->bct', e_col, proj)
    t_mask = jnp.arange(T)[None, None, :] >= x_len[:, None, None]
    att_val = jnp.where(t_mask, -100.0, att_val)
    att = jax.nn.softmax(att_val, axis=-1)
    k_sel = jnp.einsum('bct,btn->bcn', att, h_enc)
    hid = jnp.tanh(k_sel @ k_w.T + k_b + e_col @ col_w.T + col_b)
    score = (hid @ out_w.T + out_b)[..., 0]
    c_mask = jnp.arange(C)[None, :] >= col_num[:, None]
    return jnp.where(c_mask, -100.0, score)


if __name__ == "__main__":
    key = jax.random.PRNGKey(0)

    # Small shapes consistent with the module.
    N_word, N_h, N_depth, max_tok_num = 16, 32, 2, 200
    B = 2
    x_len_list = [8, 6]
    max_x_len = max(x_len_list)                 # T = 8
    col_len_list = [5, 3]                       # columns per example
    col_num_list = [5, 3]
    col_name_len_list = [2, 3, 1, 4, 2, 3, 1, 2]  # per-column-name token counts
    total_cols = sum(col_len_list)
    max_name_len = max(col_name_len_list)

    key, k_model, k_x, k_c = jax.random.split(key, 4)
    model = SelPredictorPallas(N_word, N_h, N_depth, max_tok_num, use_ca=True,
                               key=k_model)

    x_emb_var = jax.random.normal(k_x, (B, max_x_len, N_word), jnp.float32)
    col_inp_var = jax.random.normal(k_c, (total_cols, max_name_len, N_word),
                                    jnp.float32)
    x_len = jnp.array(x_len_list, jnp.int32)
    col_name_len = jnp.array(col_name_len_list, jnp.int32)
    col_num = jnp.array(col_num_list, jnp.int32)

    # num_blocks=1: fully collapsed grid (v5e/v6e single TC); use 2 on v7x.
    sel_score = model(x_emb_var, x_len, col_inp_var, col_name_len,
                      col_len_list, col_num, num_blocks=1)
    sel_score = jax.block_until_ready(sel_score)

    # Validate kernel against a plain-JAX f32 reference of the same math.
    # Kernel matmuls use bf16 MXU inputs with f32 accumulation -> loosened tol.
    e_col, h_enc = model.encode(x_emb_var, x_len, col_inp_var, col_name_len,
                                col_len_list)
    ref = reference_scores(e_col, h_enc, x_len, col_num,
                           model.att_w, model.att_b, model.k_w, model.k_b,
                           model.col_w, model.col_b, model.out_w, model.out_b)
    assert sel_score.shape == (B, max(col_len_list))
    assert jnp.allclose(sel_score, ref, atol=5e-2, rtol=5e-2), (sel_score, ref)

    print("KERNEL_OK")
</pallas_src>

<mosaic_0001>
module attributes {stable_mosaic.version = 11 : i64} {
  func.func @_sel_score_kernel(%arg0: i32, %arg1: memref<2x1x1xi32, #tpu.memory_space<vmem>>, %arg2: memref<2x1xi32, #tpu.memory_space<vmem>>, %arg3: memref<2x16x128xbf16, #tpu.memory_space<vmem>>, %arg4: memref<2x16x128xbf16, #tpu.memory_space<vmem>>, %arg5: memref<128x128xbf16, #tpu.memory_space<vmem>>, %arg6: memref<1x128xf32, #tpu.memory_space<vmem>>, %arg7: memref<256x128xbf16, #tpu.memory_space<vmem>>, %arg8: memref<1x128xf32, #tpu.memory_space<vmem>>, %arg9: memref<1x128xf32, #tpu.memory_space<vmem>>, %arg10: memref<1x1xf32, #tpu.memory_space<smem>>, %arg11: memref<2x16xf32, #tpu.memory_space<vmem>>) attributes {dimension_semantics = [#tpu.dimension_semantics<parallel>], iteration_bounds = array<i64: 1>, scalar_prefetch = 0 : i64, scratch_operands = 0 : i64, tpu.core_type = #tpu.core_type<tc>, window_params = [{transform_indices = @transform_0, window_bounds = array<i64: 2, 1, 1>}, {transform_indices = @transform_1, window_bounds = array<i64: 2, 1>}, {transform_indices = @transform_2, window_bounds = array<i64: 2, 16, 128>}, {transform_indices = @transform_3, window_bounds = array<i64: 2, 16, 128>}, {pipeline_mode = #tpu.pipeline_mode<synchronous>, transform_indices = @transform_4, window_bounds = array<i64: 128, 128>}, {pipeline_mode = #tpu.pipeline_mode<synchronous>, transform_indices = @transform_5, window_bounds = array<i64: 1, 128>}, {pipeline_mode = #tpu.pipeline_mode<synchronous>, transform_indices = @transform_6, window_bounds = array<i64: 256, 128>}, {pipeline_mode = #tpu.pipeline_mode<synchronous>, transform_indices = @transform_7, window_bounds = array<i64: 1, 128>}, {pipeline_mode = #tpu.pipeline_mode<synchronous>, transform_indices = @transform_8, window_bounds = array<i64: 1, 128>}, {transform_indices = @transform_9, window_bounds = array<i64: 1, 1>}, {transform_indices = @transform_10, window_bounds = array<i64: 2, 16>}]} {
    %c0 = arith.constant 0 : index
    %c0_0 = arith.constant 0 : index
    %c0_1 = arith.constant 0 : index
    %0 = vector.load %arg3[%c0, %c0_0, %c0_1] : memref<2x16x128xbf16, #tpu.memory_space<vmem>>, vector<2x16x128xbf16>
    %c0_2 = arith.constant 0 : index
    %c0_3 = arith.constant 0 : index
    %c0_4 = arith.constant 0 : index
    %1 = vector.load %arg4[%c0_2, %c0_3, %c0_4] : memref<2x16x128xbf16, #tpu.memory_space<vmem>>, vector<2x16x128xbf16>
    %2 = vector.shape_cast %1 : vector<2x16x128xbf16> to vector<32x128xbf16>
    %c0_5 = arith.constant 0 : index
    %c0_6 = arith.constant 0 : index
    %3 = vector.load %arg5[%c0_5, %c0_6] : memref<128x128xbf16, #tpu.memory_space<vmem>>, vector<128x128xbf16>
    %cst = arith.constant dense<0.000000e+00> : vector<32x128xf32>
    %4 = tpu.matmul %2, %3, %cst {dimension_numbers = #tpu.dot_dimension_numbers<[1], [0], [0], [1], [0, 0, 1, 1], [], []>} : vector<32x128xbf16>, vector<128x128xbf16>, vector<32x128xf32> -> vector<32x128xf32>
    %c0_7 = arith.constant 0 : index
    %c0_8 = arith.constant 0 : index
    %5 = vector.load %arg6[%c0_7, %c0_8] : memref<1x128xf32, #tpu.memory_space<vmem>>, vector<1x128xf32>
    %6 = vector.broadcast %5 : vector<1x128xf32> to vector<32x128xf32>
    %7 = arith.addf %4, %6 : vector<32x128xf32>
    %8 = vector.shape_cast %7 : vector<32x128xf32> to vector<2x16x128xf32>
    %9 = arith.truncf %8 : vector<2x16x128xf32> to vector<2x16x128xbf16>
    "tpu.trace_start"() <{level = 10 : i32, message = "bcn,btn->bct"}> : () -> ()
    %cst_9 = arith.constant dense<0.000000e+00> : vector<2x16x16xf32>
    %10 = tpu.matmul %0, %9, %cst_9 {dimension_numbers = #tpu.dot_dimension_numbers<[2], [2], [1], [1], [0, 0, 0, 1, 1, 1], [0], [0]>} : vector<2x16x128xbf16>, vector<2x16x128xbf16>, vector<2x16x16xf32> -> vector<2x16x16xf32>
    "tpu.trace_stop"() : () -> ()
    %11 = tpu.iota {dimensions = array<i32: 2>} : vector<2x16x16xi32>
    %c0_10 = arith.constant 0 : index
    %c0_11 = arith.constant 0 : index
    %c0_12 = arith.constant 0 : index
    %12 = vector.load %arg1[%c0_10, %c0_11, %c0_12] : memref<2x1x1xi32, #tpu.memory_space<vmem>>, vector<2x1x1xi32>
    %13 = vector.broadcast %12 : vector<2x1x1xi32> to vector<2x16x16xi32>
    %14 = arith.cmpi sge, %11, %13 : vector<2x16x16xi32>
    %cst_13 = arith.constant -1.000000e+02 : f32
    %15 = vector.broadcast %cst_13 : f32 to vector<2x16x16xf32>
    %16 = arith.select %14, %15, %10 : vector<2x16x16xi1>, vector<2x16x16xf32>
    %cst_14 = arith.constant dense<0xFF800000> : vector<2x16xf32>
    %17 = vector.multi_reduction <maximumf>, %16, %cst_14 [2] : vector<2x16x16xf32> to vector<2x16xf32>
    %18 = vector.shape_cast %17 : vector<2x16xf32> to vector<2x16x1xf32>
    %19 = vector.broadcast %18 : vector<2x16x1xf32> to vector<2x16x16xf32>
    %20 = arith.subf %16, %19 : vector<2x16x16xf32>
    %21 = math.exp %20 : vector<2x16x16xf32>
    %cst_15 = arith.constant dense<0.000000e+00> : vector<2x16xf32>
    %22 = vector.multi_reduction <add>, %21, %cst_15 [2] : vector<2x16x16xf32> to vector<2x16xf32>
    %23 = vector.shape_cast %22 : vector<2x16xf32> to vector<2x16x1xf32>
    %24 = tpu.reciprocal %23 : vector<2x16x1xf32> -> vector<2x16x1xf32>
    %25 = vector.broadcast %24 : vector<2x16x1xf32> to vector<2x16x16xf32>
    %26 = arith.mulf %21, %25 : vector<2x16x16xf32>
    %27 = arith.truncf %26 : vector<2x16x16xf32> to vector<2x16x16xbf16>
    "tpu.trace_start"() <{level = 10 : i32, message = "bct,btn->bcn"}> : () -> ()
    %cst_16 = arith.constant dense<0.000000e+00> : vector<2x16x128xf32>
    %28 = tpu.matmul %27, %1, %cst_16 {dimension_numbers = #tpu.dot_dimension_numbers<[2], [1], [1], [2], [0, 0, 0, 1, 1, 2], [0], [0]>} : vector<2x16x16xbf16>, vector<2x16x128xbf16>, vector<2x16x128xf32> -> vector<2x16x128xf32>
    "tpu.trace_stop"() : () -> ()
    %29 = arith.truncf %28 : vector<2x16x128xf32> to vector<2x16x128xbf16>
    %30 = tpu.concatenate %29, %0 in 2 : vector<2x16x128xbf16>, vector<2x16x128xbf16> -> vector<2x16x256xbf16>
    %31 = vector.shape_cast %30 : vector<2x16x256xbf16> to vector<32x256xbf16>
    %c0_17 = arith.constant 0 : index
    %c0_18 = arith.constant 0 : index
    %32 = vector.load %arg7[%c0_17, %c0_18] : memref<256x128xbf16, #tpu.memory_space<vmem>>, vector<256x128xbf16>
    %cst_19 = arith.constant dense<0.000000e+00> : vector<32x128xf32>
    %33 = tpu.matmul %31, %32, %cst_19 {dimension_numbers = #tpu.dot_dimension_numbers<[1], [0], [0], [1], [0, 0, 1, 1], [], []>} : vector<32x256xbf16>, vector<256x128xbf16>, vector<32x128xf32> -> vector<32x128xf32>
    %c0_20 = arith.constant 0 : index
    %c0_21 = arith.constant 0 : index
    %34 = vector.load %arg8[%c0_20, %c0_21] : memref<1x128xf32, #tpu.memory_space<vmem>>, vector<1x128xf32>
    %35 = vector.broadcast %34 : vector<1x128xf32> to vector<32x128xf32>
    %36 = arith.addf %33, %35 : vector<32x128xf32>
    %37 = math.tanh %36 : vector<32x128xf32>
    %38 = vector.shape_cast %37 : vector<32x128xf32> to vector<2x16x128xf32>
    %c0_22 = arith.constant 0 : index
    %c0_23 = arith.constant 0 : index
    %39 = vector.load %arg9[%c0_22, %c0_23] : memref<1x128xf32, #tpu.memory_space<vmem>>, vector<1x128xf32>
    %40 = vector.shape_cast %39 : vector<1x128xf32> to vector<1x1x128xf32>
    %41 = vector.broadcast %40 : vector<1x1x128xf32> to vector<2x16x128xf32>
    %42 = arith.mulf %38, %41 : vector<2x16x128xf32>
    %cst_24 = arith.constant dense<0.000000e+00> : vector<2x16xf32>
    %43 = vector.multi_reduction <add>, %42, %cst_24 [2] : vector<2x16x128xf32> to vector<2x16xf32>
    %c0_25 = arith.constant 0 : index
    %c0_26 = arith.constant 0 : index
    %44 = memref.load %arg10[%c0_25, %c0_26] : memref<1x1xf32, #tpu.memory_space<smem>>
    %45 = vector.broadcast %44 : f32 to vector<2x16xf32>
    %46 = arith.addf %43, %45 : vector<2x16xf32>
    %47 = tpu.iota {dimensions = array<i32: 1>} : vector<2x16xi32>
    %c0_27 = arith.constant 0 : index
    %c0_28 = arith.constant 0 : index
    %48 = vector.load %arg2[%c0_27, %c0_28] : memref<2x1xi32, #tpu.memory_space<vmem>>, vector<2x1xi32>
    %49 = vector.broadcast %48 : vector<2x1xi32> to vector<2x16xi32>
    %50 = arith.cmpi sge, %47, %49 : vector<2x16xi32>
    %cst_29 = arith.constant -1.000000e+02 : f32
    %51 = vector.broadcast %cst_29 : f32 to vector<2x16xf32>
    %52 = arith.select %50, %51, %46 : vector<2x16xi1>, vector<2x16xf32>
    %c0_30 = arith.constant 0 : index
    %c0_31 = arith.constant 0 : index
    %53 = vector.load %arg11[%c0_30, %c0_31] : memref<2x16xf32, #tpu.memory_space<vmem>>, vector<2x16xf32>
    tpu.vector_store %arg11[%c0_30, %c0_31], %52 {strides = array<i32>} : memref<2x16xf32, #tpu.memory_space<vmem>>, vector<2x16xf32>,
    return
  }
  func.func @transform_0(%arg0: i32) -> (i32, i32, i32) {
    %c0_i32 = arith.constant 0 : i32
    %c0_i32_0 = arith.constant 0 : i32
    %c0_i32_1 = arith.constant 0 : i32
    return %arg0, %c0_i32, %c0_i32_0 : i32, i32, i32
  }
  func.func @transform_1(%arg0: i32) -> (i32, i32) {
    %c0_i32 = arith.constant 0 : i32
    %c0_i32_0 = arith.constant 0 : i32
    return %arg0, %c0_i32 : i32, i32
  }
  func.func @transform_2(%arg0: i32) -> (i32, i32, i32) {
    %c0_i32 = arith.constant 0 : i32
    %c0_i32_0 = arith.constant 0 : i32
    %c0_i32_1 = arith.constant 0 : i32
    return %arg0, %c0_i32, %c0_i32_0 : i32, i32, i32
  }
  func.func @transform_3(%arg0: i32) -> (i32, i32, i32) {
    %c0_i32 = arith.constant 0 : i32
    %c0_i32_0 = arith.constant 0 : i32
    %c0_i32_1 = arith.constant 0 : i32
    return %arg0, %c0_i32, %c0_i32_0 : i32, i32, i32
  }
  func.func @transform_4(%arg0: i32) -> (i32, i32) {
    %c0_i32 = arith.constant 0 : i32
    %c0_i32_0 = arith.constant 0 : i32
    %c0_i32_1 = arith.constant 0 : i32
    return %c0_i32, %c0_i32_0 : i32, i32
  }
  func.func @transform_5(%arg0: i32) -> (i32, i32) {
    %c0_i32 = arith.constant 0 : i32
    %c0_i32_0 = arith.constant 0 : i32
    %c0_i32_1 = arith.constant 0 : i32
    return %c0_i32, %c0_i32_0 : i32, i32
  }
  func.func @transform_6(%arg0: i32) -> (i32, i32) {
    %c0_i32 = arith.constant 0 : i32
    %c0_i32_0 = arith.constant 0 : i32
    %c0_i32_1 = arith.constant 0 : i32
    return %c0_i32, %c0_i32_0 : i32, i32
  }
  func.func @transform_7(%arg0: i32) -> (i32, i32) {
    %c0_i32 = arith.constant 0 : i32
    %c0_i32_0 = arith.constant 0 : i32
    %c0_i32_1 = arith.constant 0 : i32
    return %c0_i32, %c0_i32_0 : i32, i32
  }
  func.func @transform_8(%arg0: i32) -> (i32, i32) {
    %c0_i32 = arith.constant 0 : i32
    %c0_i32_0 = arith.constant 0 : i32
    %c0_i32_1 = arith.constant 0 : i32
    return %c0_i32, %c0_i32_0 : i32, i32
  }
  func.func @transform_9(%arg0: i32) -> (i32, i32) {
    %c0_i32 = arith.constant 0 : i32
    %c0_i32_0 = arith.constant 0 : i32
    %c0_i32_1 = arith.constant 0 : i32
    return %c0_i32, %c0_i32_0 : i32, i32
  }
  func.func @transform_10(%arg0: i32) -> (i32, i32) {
    %c0_i32 = arith.constant 0 : i32
    %c0_i32_0 = arith.constant 0 : i32
    return %arg0, %c0_i32 : i32, i32
  }
}

</mosaic_0001>

<bundles_post_ra>
// kernel: tpu_custom_call.1
= control target key start
LH: loop header
LB: loop body
LE: loop exit
PB: predicated region body
PF: predicated region fallthrough
CT: control target
= control target key end

     0   :  { %16 = vsyncpa [#allocation4], 0  ;;  %s1220_s0 = inlined_call_operand.vmem [shape: s32[2,1,1], index: 0, kind: input, shape index: {}]   ;;  %s1221_s1 = inlined_call_operand.vmem [shape: s32[2,1], index: 1, kind: input, shape index: {}]   ;;  %s1222_s2 = inlined_call_operand.vmem [shape: bf16[2,16,128], index: 2, kind: input, shape index: {}]   ;;  %s1223_s3 = inlined_call_operand.hbm [shape: bf16[2,16,128], index: 3, kind: input, shape index: {}]   ;;  %s1224_s4 = inlined_call_operand.hbm [shape: bf16[128,128], index: 4, kind: input, shape index: {}]   ;;  %s1225_s5 = inlined_call_operand.vmem [shape: f32[1,128], index: 5, kind: input, shape index: {}]   ;;  %s1226_s6 = inlined_call_operand.hbm [shape: bf16[256,128], index: 6, kind: input, shape index: {}]   ;;  %s1227_s7 = inlined_call_operand.vmem [shape: f32[1,128], index: 7, kind: input, shape index: {}]   ;;  %s1228_s8 = inlined_call_operand.vmem [shape: f32[1,128], index: 8, kind: input, shape index: {}]   ;;  %s1229_s9 = inlined_call_operand.<no memory space> [shape: f32[1,1], index: 9, kind: input, shape index: {}]   ;;  %s1230_s10 = inlined_call_operand.hbm [shape: f32[2,16], index: 10, kind: output, shape index: {}]  }
   0x1   :  { %17 = vsyncpa [#allocation7], 0 }
   0x2   :  { %18 = vsyncpa [#allocation5], 0  ;;  %s1022_s13 = smov [#allocation6]   ;;  %s1023_s15 = smov [#allocation3]  }
   0x3   :  { %s42_s14 = sshll.u32 %s1022_s13, 4  ;;  %s30_s16 = sshll.u32 %s1023_s15, 4  ;;  %s43_s14 = int_to_ptr.vmem [resolvable:$true] %s42_s14  ;;  %s1086_s16 = int_to_ptr.vmem [resolvable:$true] %s30_s16 }
   0x4   :  { %s928_s19 = scalar_lea.hbm %s1224_s4, 1024 }
   0x5   :  { %p929_p0 = scmp.ne.s32.totalorder %s1224_s4, %s928_s19  ;;  %p932_p1 = scmp.lt.u32.totalorder %s928_s19, %s1224_s4 }
   0x7   :  { %p934_p2 = pnand %p932_p1, %p929_p0 }
   0x9   :  { %937 = shalt.err (!%p934_p2)
}
   0xa   :  { %s938_s24 = scalar_lea.vmem %s43_s14, 1024  ;;  %p943_p4 = scmp.lt.s32.totalorder %s43_s14, %s43_s14 }
   0xb   :  { %p939_p3 = scmp.ne.s32.totalorder %s43_s14, %s938_s24  ;;  %p944_p5 = scmp.lt.s32.totalorder %s938_s24, %s938_s24 }
   0xd   :  { %p945_p6 = por %p944_p5, %p943_p4 }
   0xf   :  { %p946_p7 = pnand %p945_p6, %p939_p3 }
  0x11   :  { %949 = shalt.err (!%p946_p7)
}
  0x12   :  { %s1024_s25 = smov 64   ;;  %s1025_s26 = smov 4  }
  0x13   :  { %48 = dma.hbm_to_vmem [thread:$0]  %s1224_s4, 1024, %s43_s14, [#allocation7], %s1024_s25, %s1024_s25, %s1025_s26  }
  0x14   :  { %s950_s11 = scalar_lea.hbm %s1223_s3, 256 }
  0x15   :  { %p951_p8 = scmp.ne.s32.totalorder %s1223_s3, %s950_s11  ;;  %p954_p9 = scmp.lt.u32.totalorder %s950_s11, %s1223_s3 }
  0x17   :  { %p956_p10 = pnand %p954_p9, %p951_p8 }
  0x19   :  { %959 = shalt.err (!%p956_p10)
}
  0x1a   :  { %s960_s18 = scalar_lea.vmem %s1086_s16, 256  ;;  %p965_p12 = scmp.lt.s32.totalorder %s1086_s16, %s1086_s16 }
  0x1b   :  { %p961_p11 = scmp.ne.s32.totalorder %s1086_s16, %s960_s18  ;;  %p966_p13 = scmp.lt.s32.totalorder %s960_s18, %s960_s18 }
  0x1d   :  { %p967_p0 = por %p966_p13, %p965_p12 }
  0x1f   :  { %p968_p1 = pnand %p967_p0, %p961_p11 }
  0x21   :  { %971 = shalt.err (!%p968_p1)
}
  0x22   :  { %36 = dma.hbm_to_vmem [thread:$0]  %s1223_s3, 256, %s1086_s16, [#allocation4], %s1024_s25, %s1024_s25, %s1025_s26  }
  0x23   :  { %s1026_s19 = smov [#allocation8]   ;;  %s972_s23 = scalar_lea.hbm %s1226_s6, 2048 }
  0x24   :  { %s56_s20 = sshll.u32 %s1026_s19, 4  ;;  %p973_p2 = scmp.ne.s32.totalorder %s1226_s6, %s972_s23  ;;  %s57_s20 = int_to_ptr.vmem [resolvable:$true] %s56_s20 }
  0x25   :  { %p976_p3 = scmp.lt.u32.totalorder %s972_s23, %s1226_s6 }
  0x27   :  { %p978_p4 = pnand %p976_p3, %p973_p2 }
  0x29   :  { %981 = shalt.err (!%p978_p4)
}
  0x2a   :  { %s982_s30 = scalar_lea.vmem %s57_s20, 2048  ;;  %p987_p6 = scmp.lt.s32.totalorder %s57_s20, %s57_s20 }
  0x2b   :  { %p983_p5 = scmp.ne.s32.totalorder %s57_s20, %s982_s30  ;;  %p988_p7 = scmp.lt.s32.totalorder %s982_s30, %s982_s30 }
  0x2d   :  { %p989_p8 = por %p988_p7, %p987_p6 }
  0x2f   :  { %p990_p9 = pnand %p989_p8, %p983_p5 }
  0x31   :  { %993 = shalt.err (!%p990_p9)
}
  0x32   :  { %62 = dma.hbm_to_vmem [thread:$0]  %s1226_s6, 2048, %s57_s20, [#allocation7], %s1024_s25, %s1024_s25, %s1025_s26  }
  0x33   :  { %1016 = dma.done.wait [#allocation4], 256  }
  0x34   :  { %1017 = vsyncadd [#allocation4], 4294967040 }
  0x35   :  { %1018 = dma.done.wait [#allocation7], 3072  }
  0x36   :  { %1019 = vsyncadd [#allocation7], 4294964224  ;;  %v876_v0 = vld [vmem:[#allocation6] sm:$0xff]   ;;  %v877_v1 = vld [vmem:[#allocation6 + $0x8] sm:$0xff]   ;;  %v1027_v10 = vmov 0.0   ;;  %vm1028_vm0 = vmmov 0   ;;  %v315_v28 = vlaneseq }
  0x37   :  { %821 = vmatprep.subr.bf16.mxu1 %v876_v0  ;;  %v878_v2 = vld [vmem:[#allocation6 + $0x10] sm:$0xff]   ;;  %v879_v3 = vld [vmem:[#allocation6 + $0x18] sm:$0xff]   ;;  %v880_v5 = vld [vmem:[#allocation6 + $0x20] sm:$0xff]   ;;  %841 = vmatprep.subr.bf16.mxu0 %v1027_v10  ;;  %v1029_v12 = vmov 0   ;;  %vm339_vm3 = vcmask 130048   ;;  %vm707_vm4 = vcmask 130112  }
  0x38   :  { %822 = vmatpush3.bf16.msra.mxu1 %v876_v0  ;;  %v884_v4 = vld [vmem:[#allocation3] sm:$0xff]   ;;  %v881_v6 = vld [vmem:[#allocation6 + $0x28] sm:$0xff]   ;;  %v883_v8 = vld [vmem:[#allocation6 + $0x38] sm:$0xff]   ;;  %843 = vmatprep.mubr.msk.bf16.mxu0 %vm1028_vm0, %v1027_v10  ;;  %v1170_v29 = vand.u32 127, %v315_v28  ;;  %vm718_vm5 = vcmask 1041409   ;;  %vm722_vm7 = vcmask 123904  }
  0x39   :  { %823 = vmatprep.subr.bf16.mxu1 %v877_v1  ;;  %837 = vmatprep.mubr.bf16.mxu1 %v884_v4  ;;  %v882_v7 = vld [vmem:[#allocation6 + $0x30] sm:$0xff]   ;;  %v1138_v9 = vld [vmem:[#allocation3 + $0x8] sm:$0xff]  }
  0x3a   :  { %v753_v11 = vld [vmem:[%s1220_s0] ss:$0 sm:$0xff]  ;;  %874 = vset.pattern.permute.xlu0 %v1029_v12  ;;  %875 = vset.pattern.permute.xlu1 %v1029_v12  ;;  %v754_v13 = vld [vmem:[%s1220_s0 + $0x1] ss:$0 sm:$0xff]  ;;  %v1160_v25 = vld [vmem:[%s1222_s2 + $0x8] sm:$0xff]  }
  0x3b   :  { %328 = vperm.xlu0 %874, %v753_v11   ;;  %v740_v15 = vld [vmem:[%s1225_s5] ss:$0 sm:$0xff]  ;;  %v894_v11 = vld [vmem:[#allocation8 + $0x58] sm:$0xff]  }
  0x3c   :  { %824 = vmatpush3.bf16.msra.mxu1 %v877_v1  ;;  %v887_v26 = vld [vmem:[%s1222_s2] sm:$0xff]   ;;  %v895_v12 = vld [vmem:[#allocation8 + $0x18] sm:$0xff]  }
  0x3d   :  { %825 = vmatprep.subr.bf16.mxu1 %v878_v2 }
  0x3f   :  { %331 = vperm.xlu0 %874, %v754_v13   ;;  %v896_v13 = vld [vmem:[#allocation8 + $0x60] sm:$0xff]  }
  0x40   :  { %826 = vmatpush3.bf16.msra.mxu1 %v878_v2 }
  0x41   :  { %827 = vmatprep.subr.bf16.mxu1 %v879_v3 }
  0x44   :  { %828 = vmatpush3.bf16.msra.mxu1 %v879_v3  ;;  %v888_v3 = vld [vmem:[#allocation8 + $0x40] sm:$0xff]  }
  0x45   :  { %829 = vmatprep.subr.bf16.mxu1 %v880_v5 }
  0x48   :  { %830 = vmatpush3.bf16.msra.mxu1 %v880_v5  ;;  %v890_v5 = vld [vmem:[#allocation8 + $0x48] sm:$0xff]  }
  0x49   :  { %831 = vmatprep.subr.bf16.mxu1 %v881_v6 }
  0x4c   :  { %832 = vmatpush3.bf16.msra.mxu1 %v881_v6  ;;  %v891_v6 = vld [vmem:[#allocation8 + $0x8] sm:$0xff]  }
  0x4d   :  { %833 = vmatprep.subr.bf16.mxu1 %v882_v7 }
  0x50   :  { %834 = vmatpush3.bf16.msra.mxu1 %v882_v7  ;;  %v892_v7 = vld [vmem:[#allocation8 + $0x50] sm:$0xff]  }
  0x51   :  { %835 = vmatprep.subr.bf16.mxu1 %v883_v8 }
  0x54   :  { %836 = vmatpush3.bf16.msra.mxu1 %v883_v8  ;;  %v893_v8 = vld [vmem:[#allocation8 + $0x10] sm:$0xff]  }
  0x55   :  { %847 = vmatprep.subr.bf16.mxu1 %v1027_v10 }
  0x57   :  { %838 = vmatmul.mubr.bf16.vlgmr.msra.gmra.mrb[0].mxu1 %v1138_v9 }
  0x58   :  { %849 = vmatprep.mubr.msk.bf16.mxu1 %vm1028_vm0, %v1027_v10 }
  0xba   :  { %v329_v27 = vpop.permute.xlu0 %328 }
  0xbb   :  { %vm333_vm2 = vcmp.ge.s32.totalorder %v1170_v29, %v329_v27 }
  0xbe   :  { %v332_v30 = vpop.permute.xlu0 %331 }
  0xbf   :  { %vm334_vm1 = vcmp.ge.s32.totalorder %v1170_v29, %v332_v30 }
 0x12a   :  { %v839_v14 = vpop.f32.mrb[0].mxu1 }
 0x12b   :  { %v204_v16 = vpop.f32.mrb[1].mxu1  ;;  %v213_v18 = vadd.f32 %v839_v14, %v740_v15  ;;  %v897_v14 = vld [vmem:[#allocation8 + $0x20] sm:$0xff]  }
 0x12c   :  { %v840_v17 = vpop.f32.mrb[2].mxu1  ;;  %v205_v21 = vadd.f32 %v740_v15, %v204_v16  ;;  %v899_v16 = vld [vmem:[#allocation8 + $0x28] sm:$0xff]  }
 0x12d   :  { %v216_v19 = vadd.f32 %v840_v17, %v740_v15  ;;  %v207_v20 = vpop.f32.mrb[3].mxu1  ;;  %v900_v17 = vld [vmem:[#allocation8 + $0x70] sm:$0xff]  }
 0x12e   :  { %v208_v22 = vadd.f32 %v740_v15, %v207_v20  ;;  %v898_v15 = vld [vmem:[#allocation8 + $0x68] sm:$0xff]  }
 0x12f   :  { %v220_v23 = vpack.c.bf16 %v216_v19, %v213_v18  ;;  %v901_v18 = vld [vmem:[#allocation8 + $0x30] sm:$0xff]  }
 0x130   :  { %v219_v24 = vpack.c.bf16 %v208_v22, %v205_v21 }
 0x131   :  { %848 = vmatpush3.bf16.xpose.msra.mxu1 %v220_v23 }
 0x132   :  { %842 = vmatpush3.bf16.xpose.msra.mxu0 %v219_v24  ;;  %853 = vmatprep.subr.bf16.mxu1 %v1027_v10 }
 0x133   :  { %793 = vmatprep.subr.bf16.mxu0 %v888_v3 }
 0x138   :  { %850 = vmatmul.mubr.bf16.vlgmr.msra.gmra.mrb[4].mxu1 %v1160_v25 }
 0x139   :  { %844 = vmatmul.mubr.bf16.vlgmr.msra.gmra.mrb[0].mxu0 %v887_v26  ;;  %854 = vmatpush3.bf16.msra.mxu1 %v884_v4  ;;  %v889_v4 = vld [vmem:[#allocation8] sm:$0xff]  }
 0x13a   :  { %855 = vmatprep.mubr.msk.bf16.mxu1 %vm1028_vm0, %v1027_v10  ;;  %859 = vmatprep.subr.bf16.mxu1 %v1027_v10 }
 0x13b   :  { %643 = vmatprep.mubr.bf16.mxu0 %v887_v26  ;;  %794 = vmatpush3.bf16.msra.mxu0 %v889_v4 }
 0x13c   :  { %795 = vmatprep.subr.bf16.mxu0 %v890_v5 }
 0x13f   :  { %796 = vmatpush3.bf16.msra.mxu0 %v891_v6 }
 0x140   :  { %797 = vmatprep.subr.bf16.mxu0 %v892_v7  ;;  %v689_v7 = vld [vmem:[%s1221_s1] sm:$0x3]  ;;  %s1030_s1 = smov [#allocation9]  }
 0x141   :  { %s730_s21 = sshll.u32 %s1030_s1, 4  ;;  %s731_s21 = int_to_ptr.vmem [resolvable:$true] %s730_s21 }
 0x142   :  { %p999_p11 = scmp.lt.s32.totalorder %s731_s21, %s731_s21 }
 0x143   :  { %798 = vmatpush3.bf16.msra.mxu0 %v893_v8 }
 0x144   :  { %799 = vmatprep.subr.bf16.mxu0 %v894_v11  ;;  %v702_v11 = vadd.s32 4294967288, %v1170_v29 }
 0x147   :  { %800 = vmatpush3.bf16.msra.mxu0 %v895_v12 }
 0x148   :  { %801 = vmatprep.subr.bf16.mxu0 %v896_v13  ;;  %v699_v13 = vshrl.u32 %v315_v28, 7 }
 0x14b   :  { %802 = vmatpush3.bf16.msra.mxu0 %v897_v14  ;;  %v684_v14 = vstv %s1229_s9  ;;  %s994_s9 = scalar_lea.vmem %s731_s21, 32 }
 0x14c   :  { %803 = vmatprep.subr.bf16.mxu0 %v898_v15  ;;  %v705_v15 = vsub.s32 %v702_v11, %v699_v13  ;;  %p995_p10 = scmp.ne.s32.totalorder %s731_s21, %s994_s9  ;;  %p1000_p12 = scmp.lt.s32.totalorder %s994_s9, %s994_s9 }
 0x14e   :  { %p1001_p13 = por %p1000_p12, %p999_p11 }
 0x14f   :  { %804 = vmatpush3.bf16.msra.mxu0 %v899_v16 }
 0x150   :  { %805 = vmatprep.subr.bf16.mxu0 %v900_v17  ;;  %p1002_p0 = pnand %p1001_p13, %p995_p10 }
 0x153   :  { %806 = vmatpush3.bf16.msra.mxu0 %v901_v18  ;;  %v700_v18 = vsub.s32 %v1170_v29, %v699_v13 }
 0x20b   :  { %v308_v31 = vpop.f32.mrb[4].mxu1 }
 0x20c   :  { %v337_v32 = vsel %vm334_vm1, -100.0, %v308_v31  ;;  %v261_v33 = vpop.f32.mrb[0].mxu0  ;;  %v851_v34 = vpop.f32.mrb[5].mxu1 }
 0x20d   :  { %v335_v35 = vsel %vm333_vm2, -100.0, %v261_v33  ;;  %v845_v36 = vpop.f32.mrb[1].mxu0  ;;  %v311_v37 = vpop.f32.mrb[6].mxu1  ;;  %v346_v38 = vsel %vm339_vm3, %v337_v32, -inf }
 0x20e   :  { %347 = vmax.xlane.f32.xlu0 %v346_v38  ;;  %v264_v39 = vpop.f32.mrb[2].mxu0  ;;  %v340_v40 = vsel %vm339_vm3, %v335_v35, -inf  ;;  %v852_v41 = vpop.f32.mrb[7].mxu1  ;;  %v338_v45 = vsel %vm334_vm1, -100.0, %v311_v37  ;;  %v902_v36 = vld [vmem:[#allocation8 + $0x78] sm:$0xff]  }
 0x20f   :  { %v336_v42 = vsel %vm333_vm2, -100.0, %v264_v39  ;;  %341 = vmax.xlane.f32.xlu1 %v340_v40  ;;  %v846_v43 = vpop.f32.mrb[3].mxu0  ;;  %v349_v46 = vsel %vm339_vm3, %v338_v45, -inf  ;;  %v903_v37 = vld [vmem:[#allocation8 + $0x38] sm:$0xff]   ;;  %807 = vmatprep.subr.bf16.mxu0 %v902_v36 }
 0x210   :  { %v343_v44 = vsel %vm339_vm3, %v336_v42, -inf  ;;  %808 = vmatpush3.bf16.msra.mxu0 %v903_v37 }
 0x213   :  { %344 = vmax.xlane.f32.xlu1 %v343_v44 }
 0x217   :  { %350 = vmax.xlane.f32.xlu1 %v349_v46 }
 0x29b   :  { %v348_v47 = vpop.xlane.xlu0 %347 }
 0x29c   :  { %v342_v48 = vpop.xlane.xlu1 %341  ;;  %v354_v50 = vsub.f32 %v337_v32, %v348_v47  ;;  %v757_v47 = vld [vmem:[%s1227_s7] ss:$0 sm:$0xff] }
 0x29d   :  { %v352_v49 = vsub.f32 %v335_v35, %v342_v48 }
 0x29e   :  { %v360_v54 = vmul.f32 1.442695, %v354_v50 }
 0x29f   :  { %v356_v51 = vmul.f32 1.442695, %v352_v49 }
 0x2a0   :  { %v345_v52 = vpop.xlane.xlu1 %344 }
 0x2a1   :  { %904 = vpow2.f32 %v356_v51  ;;  %v353_v53 = vsub.f32 %v336_v42, %v345_v52 }
 0x2a3   :  { %v358_v55 = vmul.f32 1.442695, %v353_v53 }
 0x2a4   :  { %v351_v56 = vpop.xlane.xlu1 %350 }
 0x2a5   :  { %906 = vpow2.f32 %v358_v55  ;;  %v355_v57 = vsub.f32 %v338_v45, %v351_v56 }
 0x2a6   :  { %908 = vpow2.f32 %v360_v54 }
 0x2a7   :  { %v362_v58 = vmul.f32 1.442695, %v355_v57 }
 0x2a9   :  { %910 = vpow2.f32 %v362_v58 }
 0x2ab   :  { %v905_v59 = vpop.eup %904 }
 0x2ac   :  { %v364_v60 = vsel %vm339_vm3, %v905_v59, 0.0 }
 0x2ad   :  { %365 = vadd.xlane.f32.xlu1 %v364_v60 }
 0x2af   :  { %v907_v61 = vpop.eup %906 }
 0x2b0   :  { %v367_v62 = vsel %vm339_vm3, %v907_v61, 0.0  ;;  %v909_v63 = vpop.eup %908 }
 0x2b1   :  { %368 = vadd.xlane.f32.xlu1 %v367_v62  ;;  %v370_v0 = vsel %vm339_vm3, %v909_v63, 0.0  ;;  %v774_v62 = vld [vmem:[%s1228_s8] ss:$0 sm:$0xff] }
 0x2b3   :  { %v911_v1 = vpop.eup %910 }
 0x2b4   :  { %v373_v2 = vsel %vm339_vm3, %v911_v1, 0.0 }
 0x2b5   :  { %371 = vadd.xlane.f32.xlu1 %v370_v0 }
 0x2b9   :  { %374 = vadd.xlane.f32.xlu1 %v373_v2 }
 0x33a   :  { %v366_v19 = vpop.xlane.xlu1 %365 }
 0x33b   :  { %912 = vrcp.f32 %v366_v19 }
 0x33e   :  { %v369_v20 = vpop.xlane.xlu1 %368 }
 0x33f   :  { %914 = vrcp.f32 %v369_v20 }
 0x342   :  { %v372_v21 = vpop.xlane.xlu1 %371 }
 0x343   :  { %916 = vrcp.f32 %v372_v21 }
 0x345   :  { %v913_v23 = vpop.eup %912 }
 0x346   :  { %v375_v22 = vpop.xlane.xlu1 %374  ;;  %v380_v26 = vmul.f32 %v913_v23, %v905_v59 }
 0x347   :  { %918 = vrcp.f32 %v375_v22 }
 0x349   :  { %v915_v24 = vpop.eup %914 }
 0x34a   :  { %v381_v27 = vmul.f32 %v915_v24, %v907_v61 }
 0x34c   :  { %v384_v30 = vpack.c.bf16 %v381_v27, %v380_v26 }
 0x34d   :  { %v917_v31 = vpop.eup %916 }
 0x34e   :  { %856 = vmatmul.mubr.msk.bf16.vlgmr.msra.gmra.mrb[8].mxu1 %vm339_vm3, %v384_v30  ;;  %v382_v33 = vmul.f32 %v917_v31, %v909_v63 }
 0x34f   :  { %860 = vmatpush3.bf16.msra.mxu1 %v1138_v9  ;;  %861 = vmatprep.mubr.msk.bf16.mxu1 %vm1028_vm0, %v1027_v10 }
 0x351   :  { %v919_v32 = vpop.eup %918 }
 0x352   :  { %v383_v34 = vmul.f32 %v919_v32, %v911_v1 }
 0x354   :  { %v385_v35 = vpack.c.bf16 %v383_v34, %v382_v33 }
 0x356   :  { %862 = vmatmul.mubr.msk.bf16.vlgmr.msra.gmra.mrb[12].mxu1 %vm339_vm3, %v385_v35 }
 0x421   :  { %v423_v38 = vpop.f32.mrb[8].mxu1 }
 0x422   :  { %v857_v39 = vpop.f32.mrb[9].mxu1 }
 0x423   :  { %v426_v40 = vpop.f32.mrb[10].mxu1 }
 0x424   :  { %v474_v41 = vpack.c.bf16 %v426_v40, %v423_v38  ;;  %v858_v42 = vpop.f32.mrb[11].mxu1 }
 0x426   :  { %644 = vmatmul.mubr.bf16.vlgmr.msra.gmra.mrb[4].mxu0 %v474_v41 }
 0x427   :  { %651 = vmatprep.mubr.bf16.mxu0 %v1160_v25 }
 0x429   :  { %v467_v9 = vpop.f32.mrb[12].mxu1 }
 0x42a   :  { %v863_v10 = vpop.f32.mrb[13].mxu1 }
 0x42b   :  { %v470_v43 = vpop.f32.mrb[14].mxu1 }
 0x42c   :  { %v475_v44 = vpack.c.bf16 %v470_v43, %v467_v9  ;;  %v864_v45 = vpop.f32.mrb[15].mxu1 }
 0x42e   :  { %652 = vmatmul.mubr.bf16.gmra.mrb[8].mxu0 %v475_v44 }
 0x4f9   :  { %v809_v46 = vpop.f32.mrb[4].mxu0 }
 0x4fa   :  { %v810_v48 = vpop.f32.mrb[5].mxu0 }
 0x4fb   :  { %v811_v49 = vadd.f32 %v810_v48, %v809_v46  ;;  %v812_v50 = vpop.f32.mrb[6].mxu0 }
 0x4fc   :  { %v813_v51 = vpop.f32.mrb[7].mxu0 }
 0x4fd   :  { %v646_v52 = vadd.f32 %v811_v49, %v757_v47  ;;  %v814_v53 = vadd.f32 %v813_v51, %v812_v50 }
 0x4ff   :  { %920 = vtanh.f32 %v646_v52  ;;  %v649_v54 = vadd.f32 %v814_v53, %v757_v47 }
 0x501   :  { %922 = vtanh.f32 %v649_v54  ;;  %v815_v25 = vpop.f32.mrb[8].mxu0 }
 0x502   :  { %v816_v55 = vpop.f32.mrb[9].mxu0 }
 0x503   :  { %v817_v56 = vadd.f32 %v816_v55, %v815_v25  ;;  %v818_v57 = vpop.f32.mrb[10].mxu0 }
 0x504   :  { %v819_v58 = vpop.f32.mrb[11].mxu0 }
 0x505   :  { %v654_v59 = vadd.f32 %v817_v56, %v757_v47  ;;  %v820_v60 = vadd.f32 %v819_v58, %v818_v57 }
 0x507   :  { %924 = vtanh.f32 %v654_v59  ;;  %v657_v61 = vadd.f32 %v820_v60, %v757_v47 }
 0x509   :  { %v921_v63 = vpop.eup %920  ;;  %926 = vtanh.f32 %v657_v61 }
 0x50a   :  { %v671_v0 = vmul.f32 %v921_v63, %v774_v62 }
 0x50b   :  { %v923_v1 = vpop.eup %922 }
 0x50c   :  { %675 = vadd.xlane.f32.xlu1 %v671_v0  ;;  %v672_v2 = vmul.f32 %v923_v1, %v774_v62 }
 0x510   :  { %677 = vadd.xlane.f32.xlu1 %v672_v2 }
 0x511   :  { %v925_v3 = vpop.eup %924 }
 0x512   :  { %v673_v4 = vmul.f32 %v925_v3, %v774_v62 }
 0x513   :  { %v927_v5 = vpop.eup %926 }
 0x514   :  { %679 = vadd.xlane.f32.xlu1 %v673_v4  ;;  %v674_v6 = vmul.f32 %v927_v5, %v774_v62 }
 0x516   :  { %681 = vadd.xlane.f32.xlu0 %v674_v6 }
 0x525   :  { %691 = vperm.xlu1 %875, %v689_v7  }
 0x599   :  { %v676_v8 = vpop.xlane.xlu1 %675 }
 0x59a   :  { %v685_v19 = vadd.f32 %v684_v14, %v676_v8 }
 0x59c   :  { %v701_v26 = vrot.slane %v685_v19, %v700_v18 }
 0x59d   :  { %v678_v12 = vpop.xlane.xlu1 %677 }
 0x59e   :  { %v686_v16 = vadd.f32 %v684_v14, %v678_v12 }
 0x5a0   :  { %v706_v22 = vrot.slane %v686_v16, %v705_v15 }
 0x5a1   :  { %v680_v17 = vpop.xlane.xlu1 %679 }
 0x5a2   :  { %v687_v20 = vadd.f32 %v684_v14, %v680_v17  ;;  %v708_v28 = vsel %vm707_vm4, %v706_v22, %v701_v26 }
 0x5a3   :  { %v682_v21 = vpop.xlane.xlu0 %681 }
 0x5a4   :  { %v688_v23 = vadd.f32 %v684_v14, %v682_v21  ;;  %v712_v27 = vrot.slane %v687_v20, %v700_v18 }
 0x5a5   :  { %v692_v24 = vpop.permute.xlu1 %691 }
 0x5a6   :  { %v716_v30 = vrot.slane %v688_v23, %v705_v15  ;;  %vm693_vm6 = vcmp.ge.s32.totalorder %v1170_v29, %v692_v24 }
 0x5a8   :  { %v717_v31 = vsel %vm707_vm4, %v716_v30, %v712_v27 }
 0x5a9   :  { %v719_v32 = vsel %vm718_vm5, %v717_v31, %v708_v28 }
 0x5aa   :  { %v721_v33 = vsel %vm693_vm6, -100.0, %v719_v32 }
 0x5ab   :  { %723 = vst.msk [vmem:[#allocation9] sm:$0x3] %vm722_vm7, %v721_v33 }
 0x5ac   :  { %1005 = shalt.err (!%p1002_p0)
}
 0x5ad   :  { %s1006_s24 = scalar_lea.hbm %s1230_s10, 32 }
 0x5ae   :  { %p1007_p1 = scmp.ne.s32.totalorder %s1230_s10, %s1006_s24  ;;  %p1010_p2 = scmp.lt.u32.totalorder %s1006_s24, %s1230_s10 }
 0x5b0   :  { %p1012_p3 = pnand %p1010_p2, %p1007_p1 }
 0x5b2   :  { %1015 = shalt.err (!%p1012_p3)
}
 0x5b3   :  { %733 = dma.vmem_to_hbm [thread:$0]  %s731_s21, 32, %s1230_s10, [#allocation5]  }
 0x5b4   :  { %1020 = dma.done.wait [#allocation5], 32  }
 0x5b5   :  { %1021 = vsyncadd [#allocation5], 4294967264 }
 0x5b6   :  { %737 = vsyncpa [#allocation4], 1 }
 0x5b7   :  { %738 = vsyncpa [#allocation7], 1 }
 0x5b8   :  { %739 = vsyncpa [#allocation5], 1 }

</bundles_post_ra>
